<compile_context>
chip_gen: v5e
topology: v5e:2x2
jax: 0.10.0
libtpu: 0.0.40
codegen_flags: <defaults>
</compile_context>

<pallas_src>
import functools

import jax
import jax.numpy as jnp
from jax import lax
from jax.experimental import pallas as pl
from jax.experimental.pallas import tpu as pltpu


_LANE = 128


def _round_up(x, m):
    return ((x + m - 1) // m) * m


def _vmem_budget_bytes():
    """Generation-aware scoped-VMEM request (v5e/v6e: 128 MiB phys, v7x: 64 MiB)."""
    try:
        phys = int(pltpu.get_tpu_info().vmem_capacity_bytes)
    except Exception:
        phys = 64 * 1024 * 1024  # conservative default (v7x-sized)
    # Leave headroom for Mosaic internal scratch; never request below 16 MiB.
    return max(16 << 20, min(int(phys * 0.70), 96 << 20))


def _spec(block_shape, index_map, *, single_buffer=False):
    """BlockSpec, optionally single-buffered for constant (resident) operands."""
    if single_buffer:
        try:
            return pl.BlockSpec(block_shape, index_map,
                                pipeline_mode=pl.Buffered(1))
        except Exception:  # older jax without pipeline_mode: default buffering
            pass
    return pl.BlockSpec(block_shape, index_map)


def _tile_b_fused(f_pad, x_item, o_item, w_item, budget):
    """Batch tile for the resident-weight fused path; None if weights don't fit."""
    weight_bytes = f_pad * (2 * f_pad) * w_item  # Buffered(1): single copy
    # double-buffered x/out tiles + ~32 B/row/feature of f32 body temporaries
    per_row = f_pad * (2 * x_item + 2 * o_item + 32)
    avail = budget - weight_bytes - (1 << 20)
    if avail < per_row * 8:
        return None
    tile_b = avail // per_row
    # cap the x tile at ~4 MiB (already past ~85% of HBM roofline per measurement)
    tile_b = min(tile_b, max(8, (4 << 20) // (f_pad * x_item)))
    return max(8, (int(tile_b) // 8) * 8)


def _tile_b_ntiled(f_pad, tile_n, x_item, o_item, w_item, budget):
    """Batch tile for the output-column-tiled (large-F) path."""
    weight_bytes = 2 * (2 * f_pad * tile_n * w_item)  # double-buffered (2,Fp,tn)
    per_row = 2 * f_pad * x_item + tile_n * (2 * x_item + 2 * o_item + 32)
    avail = budget - weight_bytes - (1 << 20)
    tile_b = (avail // per_row) if avail > per_row * 8 else 8
    tile_b = min(tile_b, max(8, (4 << 20) // (f_pad * x_item)))
    return max(8, (int(tile_b) // 8) * 8)


def _clamp_batch_tile(tile_b, batch):
    """Clamp to the batch; keep >=2 grid tiles when possible (v7x megacore)."""
    if tile_b >= batch:
        return batch if batch < 16 else _round_up((batch + 1) // 2, 8)
    return tile_b


# ----------------------------- kernels --------------------------------------


def _highway_fused_kernel(x_ref, w_ref, b_ref, o_ref, *, f_pad):
    # x_ref: (TB, Fp); w_ref: (Fp, 2Fp) = [W_h.T | W_t.T]; b_ref: (1, 2Fp) f32
    x = x_ref[...]
    wx = jnp.dot(x, w_ref[...], preferred_element_type=jnp.float32)
    wx = wx + b_ref[...]
    h_lin = wx[:, :f_pad]          # lane-aligned static split (Fp % 128 == 0)
    t_lin = wx[:, f_pad:]
    h = jnp.tanh(h_lin)                              # EUP
    t = 0.5 * (jnp.tanh(0.5 * t_lin) + 1.0)          # sigmoid via one tanh (EUP)
    xf = x.astype(jnp.float32)
    o_ref[...] = (xf + t * (h - xf)).astype(o_ref.dtype)


def _highway_ntiled_kernel(xk_ref, xm_ref, w_ref, b_ref, o_ref):
    # xk_ref: (TB, Fp)   full-K row slab (resident across the n axis)
    # xm_ref: (TB, TN)   output-column slice of x for the carry mix
    # w_ref:  (2, Fp, TN)  [0] = W_h.T columns, [1] = W_t.T columns
    # b_ref:  (2, 1, TN)   f32
    xk = xk_ref[...]
    h_lin = jnp.dot(xk, w_ref[0], preferred_element_type=jnp.float32) + b_ref[0]
    t_lin = jnp.dot(xk, w_ref[1], preferred_element_type=jnp.float32) + b_ref[1]
    h = jnp.tanh(h_lin)
    t = 0.5 * (jnp.tanh(0.5 * t_lin) + 1.0)
    xf = xm_ref[...].astype(jnp.float32)
    o_ref[...] = (xf + t * (h - xf)).astype(o_ref.dtype)


# ----------------------------- wrapper ---------------------------------------


def highway_forward(x, weight, bias, *, tile_b=None, tile_n=None,
                    force_weight_tiling=False):
    """x: (B, F); weight: (2F, F) (torch Linear layout); bias: (2F,)."""
    B, F = x.shape
    assert weight.shape == (2 * F, F)
    assert bias.shape == (2 * F,)

    f_pad = _round_up(F, _LANE)
    x_item = x.dtype.itemsize
    o_item = x.dtype.itemsize
    w_item = weight.dtype.itemsize
    budget = _vmem_budget_bytes()

    # Host-side prep: pre-transposed, lane-dense, zero-padded gate weights.
    pad_w = ((0, f_pad - F), (0, f_pad - F))
    w_h_t = jnp.pad(weight[:F].T, pad_w)               # (Fp, Fp) = padded W_h.T
    w_t_t = jnp.pad(weight[F:].T, pad_w)               # (Fp, Fp) = padded W_t.T
    b_h = jnp.pad(bias[:F], (0, f_pad - F)).astype(jnp.float32)
    b_t = jnp.pad(bias[F:], (0, f_pad - F)).astype(jnp.float32)
    x_p = jnp.pad(x, ((0, 0), (0, f_pad - F))) if f_pad != F else x

    resident_w_bytes = f_pad * 2 * f_pad * w_item
    use_resident = (not force_weight_tiling) and \
        resident_w_bytes <= int(0.4 * budget)

    if use_resident:
        tb = tile_b if tile_b is not None else \
            _tile_b_fused(f_pad, x_item, o_item, w_item, budget)
        if tb is None:
            use_resident = False

    if use_resident:
        # --------- Path A: resident weights, single fused gate matmul ---------
        tb = _clamp_batch_tile(tb, B)
        grid = (pl.cdiv(B, tb),)

        w_comb = jnp.concatenate([w_h_t, w_t_t], axis=1)        # (Fp, 2Fp)
        b_comb = jnp.concatenate([b_h, b_t]).reshape(1, 2 * f_pad)

        kernel = functools.partial(_highway_fused_kernel, f_pad=f_pad)
        out_padded = pl.pallas_call(
            kernel,
            out_shape=jax.ShapeDtypeStruct((B, f_pad), x.dtype),
            grid_spec=pltpu.PrefetchScalarGridSpec(
                num_scalar_prefetch=0,
                grid=grid,
                in_specs=[
                    pl.BlockSpec((tb, f_pad), lambda i: (i, 0)),          # x rows
                    _spec((f_pad, 2 * f_pad), lambda i: (0, 0),
                          single_buffer=True),                            # W_comb
                    _spec((1, 2 * f_pad), lambda i: (0, 0),
                          single_buffer=True),                            # bias
                ],
                out_specs=pl.BlockSpec((tb, f_pad), lambda i: (i, 0)),
            ),
            compiler_params=pltpu.CompilerParams(
                dimension_semantics=("parallel",),
                vmem_limit_bytes=int(budget),
            ),
        )(x_p, w_comb, b_comb)
    else:
        # --------- Path B: large F -> tile the output columns (n axis) --------
        if tile_n is None:
            tile_n = 256 if (f_pad % 256 == 0) else 128
        assert f_pad % tile_n == 0 and tile_n % _LANE == 0

        tb = tile_b if tile_b is not None else \
            _tile_b_ntiled(f_pad, tile_n, x_item, o_item, w_item, budget)
        tb = _clamp_batch_tile(tb, B)
        grid = (pl.cdiv(B, tb), f_pad // tile_n)

        w_stack = jnp.stack([w_h_t, w_t_t])                     # (2, Fp, Fp)
        b_stack = jnp.stack([b_h.reshape(1, f_pad),
                             b_t.reshape(1, f_pad)])            # (2, 1, Fp)

        out_padded = pl.pallas_call(
            _highway_ntiled_kernel,
            out_shape=jax.ShapeDtypeStruct((B, f_pad), x.dtype),
            grid_spec=pltpu.PrefetchScalarGridSpec(
                num_scalar_prefetch=0,
                grid=grid,
                in_specs=[
                    pl.BlockSpec((tb, f_pad), lambda i, j: (i, 0)),   # x (full K)
                    pl.BlockSpec((tb, tile_n), lambda i, j: (i, j)),  # x mix cols
                    pl.BlockSpec((2, f_pad, tile_n),
                                 lambda i, j: (0, 0, j)),             # W columns
                    pl.BlockSpec((2, 1, tile_n),
                                 lambda i, j: (0, 0, j)),             # bias cols
                ],
                out_specs=pl.BlockSpec((tb, tile_n), lambda i, j: (i, j)),
            ),
            compiler_params=pltpu.CompilerParams(
                dimension_semantics=("parallel", "parallel"),
                vmem_limit_bytes=int(budget),
            ),
        )(x_p, x_p, w_stack, b_stack)

    return out_padded[:, :F] if f_pad != F else out_padded


def reference_forward(x, weight, bias):
    wx = jnp.dot(x, weight.T, precision=lax.Precision.HIGHEST) + bias
    F = x.shape[1]
    h, t = wx[:, :F], wx[:, F:]
    h = jnp.tanh(h)
    t = jax.nn.sigmoid(t)
    return h * t + x * (1.0 - t)


if __name__ == "__main__":
    # --- primary test: the module-implied small shape (B=8, F=32) -------------
    features = 32
    batch = 8

    key = jax.random.PRNGKey(0)
    kx, kw, kb = jax.random.split(key, 3)

    x = jax.random.normal(kx, (batch, features), dtype=jnp.float32)
    # nn.init.uniform(W.weight, -0.02, 0.02)   (torch weight layout (2F, F))
    weight = jax.random.uniform(
        kw, (2 * features, features), dtype=jnp.float32,
        minval=-0.02, maxval=0.02)
    # bias keeps torch Linear default: U(-1/sqrt(F), 1/sqrt(F))
    bound = 1.0 / (features ** 0.5)
    bias = jax.random.uniform(
        kb, (2 * features,), dtype=jnp.float32, minval=-bound, maxval=bound)

    out = jax.block_until_ready(highway_forward(x, weight, bias))
    ref = reference_forward(x, weight, bias)
    assert out.shape == (batch, features)
    assert jnp.allclose(out, ref, atol=1e-5, rtol=1e-5), "mismatch vs reference"

    # --- secondary check: exercise the column-tiled (large-F fallback) path ---
    f2, b2 = 256, 24
    k2x, k2w, k2b = jax.random.split(jax.random.PRNGKey(1), 3)
    x2 = jax.random.normal(k2x, (b2, f2), dtype=jnp.float32)
    w2 = jax.random.uniform(k2w, (2 * f2, f2), dtype=jnp.float32,
                            minval=-0.02, maxval=0.02)
    bound2 = 1.0 / (f2 ** 0.5)
    bb2 = jax.random.uniform(k2b, (2 * f2,), dtype=jnp.float32,
                             minval=-bound2, maxval=bound2)
    out2 = jax.block_until_ready(
        highway_forward(x2, w2, bb2, force_weight_tiling=True, tile_n=128))
    ref2 = reference_forward(x2, w2, bb2)
    assert out2.shape == (b2, f2)
    assert jnp.allclose(out2, ref2, atol=2e-5, rtol=2e-5), "mismatch (tiled path)"

    print("KERNEL_OK")
</pallas_src>

<mosaic_0001>
module attributes {stable_mosaic.version = 11 : i64} {
  func.func @_highway_fused_kernel(%arg0: i32, %arg1: memref<8x128xf32, #tpu.memory_space<vmem>>, %arg2: memref<128x256xf32, #tpu.memory_space<vmem>>, %arg3: memref<1x256xf32, #tpu.memory_space<vmem>>, %arg4: memref<8x128xf32, #tpu.memory_space<vmem>>) attributes {dimension_semantics = [#tpu.dimension_semantics<parallel>], iteration_bounds = array<i64: 1>, scalar_prefetch = 0 : i64, scratch_operands = 0 : i64, tpu.core_type = #tpu.core_type<tc>, window_params = [{transform_indices = @transform_0, window_bounds = array<i64: 8, 128>}, {pipeline_mode = #tpu.pipeline_mode<synchronous>, transform_indices = @transform_1, window_bounds = array<i64: 128, 256>}, {pipeline_mode = #tpu.pipeline_mode<synchronous>, transform_indices = @transform_2, window_bounds = array<i64: 1, 256>}, {transform_indices = @transform_3, window_bounds = array<i64: 8, 128>}]} {
    %c0 = arith.constant 0 : index
    %c0_0 = arith.constant 0 : index
    %0 = vector.load %arg1[%c0, %c0_0] : memref<8x128xf32, #tpu.memory_space<vmem>>, vector<8x128xf32>
    %c0_1 = arith.constant 0 : index
    %c0_2 = arith.constant 0 : index
    %1 = vector.load %arg2[%c0_1, %c0_2] : memref<128x256xf32, #tpu.memory_space<vmem>>, vector<128x256xf32>
    %cst = arith.constant dense<0.000000e+00> : vector<8x256xf32>
    %2 = tpu.matmul %0, %1, %cst {dimension_numbers = #tpu.dot_dimension_numbers<[1], [0], [0], [1], [0, 0, 1, 1], [], []>} : vector<8x128xf32>, vector<128x256xf32>, vector<8x256xf32> -> vector<8x256xf32>
    %c0_3 = arith.constant 0 : index
    %c0_4 = arith.constant 0 : index
    %3 = vector.load %arg3[%c0_3, %c0_4] : memref<1x256xf32, #tpu.memory_space<vmem>>, vector<1x256xf32>
    %4 = vector.broadcast %3 : vector<1x256xf32> to vector<8x256xf32>
    %5 = arith.addf %2, %4 : vector<8x256xf32>
    %6 = vector.extract_strided_slice %5 {offsets = [0, 0], sizes = [8, 128], strides = [1, 1]} : vector<8x256xf32> to vector<8x128xf32>
    %7 = vector.extract_strided_slice %5 {offsets = [0, 128], sizes = [8, 128], strides = [1, 1]} : vector<8x256xf32> to vector<8x128xf32>
    %8 = math.tanh %6 : vector<8x128xf32>
    %cst_5 = arith.constant 5.000000e-01 : f32
    %9 = vector.broadcast %cst_5 : f32 to vector<8x128xf32>
    %10 = arith.mulf %9, %7 : vector<8x128xf32>
    %11 = math.tanh %10 : vector<8x128xf32>
    %cst_6 = arith.constant 1.000000e+00 : f32
    %12 = vector.broadcast %cst_6 : f32 to vector<8x128xf32>
    %13 = arith.addf %11, %12 : vector<8x128xf32>
    %cst_7 = arith.constant 5.000000e-01 : f32
    %14 = vector.broadcast %cst_7 : f32 to vector<8x128xf32>
    %15 = arith.mulf %14, %13 : vector<8x128xf32>
    %16 = arith.subf %8, %0 : vector<8x128xf32>
    %17 = arith.mulf %15, %16 : vector<8x128xf32>
    %18 = arith.addf %0, %17 : vector<8x128xf32>
    %c0_8 = arith.constant 0 : index
    %c0_9 = arith.constant 0 : index
    %19 = vector.load %arg4[%c0_8, %c0_9] : memref<8x128xf32, #tpu.memory_space<vmem>>, vector<8x128xf32>
    tpu.vector_store %arg4[%c0_8, %c0_9], %18 {strides = array<i32>} : memref<8x128xf32, #tpu.memory_space<vmem>>, vector<8x128xf32>,
    return
  }
  func.func @transform_0(%arg0: i32) -> (i32, i32) {
    %c0_i32 = arith.constant 0 : i32
    %c0_i32_0 = arith.constant 0 : i32
    return %arg0, %c0_i32 : i32, i32
  }
  func.func @transform_1(%arg0: i32) -> (i32, i32) {
    %c0_i32 = arith.constant 0 : i32
    %c0_i32_0 = arith.constant 0 : i32
    %c0_i32_1 = arith.constant 0 : i32
    return %c0_i32, %c0_i32_0 : i32, i32
  }
  func.func @transform_2(%arg0: i32) -> (i32, i32) {
    %c0_i32 = arith.constant 0 : i32
    %c0_i32_0 = arith.constant 0 : i32
    %c0_i32_1 = arith.constant 0 : i32
    return %c0_i32, %c0_i32_0 : i32, i32
  }
  func.func @transform_3(%arg0: i32) -> (i32, i32) {
    %c0_i32 = arith.constant 0 : i32
    %c0_i32_0 = arith.constant 0 : i32
    return %arg0, %c0_i32 : i32, i32
  }
}

</mosaic_0001>

<bundles_post_ra>
// kernel: tpu_custom_call.1
= control target key start
LH: loop header
LB: loop body
LE: loop exit
PB: predicated region body
PF: predicated region fallthrough
CT: control target
= control target key end

     0   :  { %8 = vsyncpa [#allocation3], 0  ;;  %s314_s0 = inlined_call_operand.hbm [shape: f32[8,128], index: 0, kind: input, shape index: {}]   ;;  %s315_s1 = inlined_call_operand.hbm [shape: f32[128,256], index: 1, kind: input, shape index: {}]   ;;  %s316_s2 = inlined_call_operand.hbm [shape: f32[1,256], index: 2, kind: input, shape index: {}]   ;;  %s317_s3 = inlined_call_operand.hbm [shape: f32[8,128], index: 3, kind: output, shape index: {}]  }
   0x1   :  { %9 = vsyncpa [#allocation6], 0  ;;  %s26_s14 = sshll.u32 %s315_s1, 4  ;;  %s27_s14 = int_to_ptr.hbm [resolvable:$true] %s26_s14 }
   0x2   :  { %10 = vsyncpa [#allocation4], 0  ;;  %s276_s15 = smov [#allocation5]   ;;  %s16_s19 = sshll.u32 %s314_s0, 4  ;;  %s17_s19 = int_to_ptr.hbm [resolvable:$true] %s16_s19 }
   0x3   :  { %s28_s16 = sshll.u32 %s276_s15, 4  ;;  %s277_s20 = smov 256   ;;  %s29_s16 = int_to_ptr.vmem [resolvable:$true] %s28_s16 }
   0x4   :  { %s278_s21 = smov 16   ;;  %s279_s22 = smov [#allocation2]  }
   0x5   :  { %34 = dma.hbm_to_vmem [thread:$0]  %s27_s14, 4096, %s29_s16, [#allocation6], %s277_s20, %s277_s20, %s278_s21  }
   0x6   :  { %s18_s23 = sshll.u32 %s279_s22, 4  ;;  %s40_s26 = sshll.u32 %s316_s2, 4  ;;  %s19_s23 = int_to_ptr.vmem [resolvable:$true] %s18_s23  ;;  %s41_s26 = int_to_ptr.hbm [resolvable:$true] %s40_s26 }
   0x7   :  { %21 = dma.hbm_to_vmem [thread:$0]  %s17_s19, 128, %s19_s23, [#allocation3]  }
   0x8   :  { %s280_s1 = smov [#allocation7]  }
   0x9   :  { %s42_s27 = sshll.u32 %s280_s1, 4  ;;  %s43_s27 = int_to_ptr.vmem [resolvable:$true] %s42_s27 }
   0xa   :  { %45 = dma.hbm_to_vmem [thread:$0]  %s41_s26, 32, %s43_s27, [#allocation6]  }
   0xb   :  { %270 = dma.done.wait [#allocation3], 128  }
   0xc   :  { %271 = vsyncadd [#allocation3], 4294967168 }
   0xd   :  { %272 = dma.done.wait [#allocation6], 4128  }
   0xe   :  { %273 = vsyncadd [#allocation6], 4294963168  ;;  %v90_v0 = vld [vmem:[#allocation5 + $0xf8] sm:$0xff]  ;;  %v88_v1 = vld [vmem:[#allocation5 + $0xe8] sm:$0xff]  ;;  %s281_s0 = smov [#allocation8]   ;;  %s153_s30 = sshll.u32 %s317_s3, 4  ;;  %s154_s30 = int_to_ptr.hbm [resolvable:$true] %s153_s30 }
   0xf   :  { %v89_v2 = vld [vmem:[#allocation5 + $0xf0] sm:$0xff]  ;;  %117 = vmatpush.msra.mxu1 %v90_v0  ;;  %v87_v3 = vld [vmem:[#allocation5 + $0xe0] sm:$0xff]  ;;  %v86_v4 = vld [vmem:[#allocation5 + $0xd8] sm:$0xff]  ;;  %s151_s2 = sshll.u32 %s281_s0, 4  ;;  %s152_s2 = int_to_ptr.vmem [resolvable:$true] %s151_s2 }
  0x10   :  { %97 = vmatpush.msra.mxu0 %v89_v2  ;;  %v85_v5 = vld [vmem:[#allocation5 + $0xd0] sm:$0xff]  ;;  %v84_v6 = vld [vmem:[#allocation5 + $0xc8] sm:$0xff]  ;;  %v83_v7 = vld [vmem:[#allocation5 + $0xc0] sm:$0xff] }
  0x11   :  { %118 = vmatpush.msra.mxu1 %v88_v1  ;;  %v82_v8 = vld [vmem:[#allocation5 + $0xb8] sm:$0xff]  ;;  %v81_v9 = vld [vmem:[#allocation5 + $0xb0] sm:$0xff]  ;;  %v80_v10 = vld [vmem:[#allocation5 + $0xa8] sm:$0xff] }
  0x12   :  { %98 = vmatpush.msra.mxu0 %v87_v3  ;;  %v79_v11 = vld [vmem:[#allocation5 + $0xa0] sm:$0xff]  ;;  %v78_v12 = vld [vmem:[#allocation5 + $0x98] sm:$0xff]  ;;  %v77_v13 = vld [vmem:[#allocation5 + $0x90] sm:$0xff] }
  0x13   :  { %119 = vmatpush.msra.mxu1 %v86_v4  ;;  %v76_v14 = vld [vmem:[#allocation5 + $0x88] sm:$0xff]  ;;  %v75_v15 = vld [vmem:[#allocation5 + $0x80] sm:$0xff]  ;;  %v74_v16 = vld [vmem:[#allocation5 + $0x78] sm:$0xff] }
  0x14   :  { %99 = vmatpush.msra.mxu0 %v85_v5  ;;  %v73_v17 = vld [vmem:[#allocation5 + $0x70] sm:$0xff]  ;;  %v72_v18 = vld [vmem:[#allocation5 + $0x68] sm:$0xff]  ;;  %v71_v19 = vld [vmem:[#allocation5 + $0x60] sm:$0xff] }
  0x15   :  { %120 = vmatpush.msra.mxu1 %v84_v6  ;;  %v70_v20 = vld [vmem:[#allocation5 + $0x58] sm:$0xff]  ;;  %v69_v21 = vld [vmem:[#allocation5 + $0x50] sm:$0xff]  ;;  %v68_v22 = vld [vmem:[#allocation5 + $0x48] sm:$0xff] }
  0x16   :  { %100 = vmatpush.msra.mxu0 %v83_v7  ;;  %v67_v23 = vld [vmem:[#allocation5 + $0x40] sm:$0xff]  ;;  %v66_v24 = vld [vmem:[#allocation5 + $0x38] sm:$0xff]  ;;  %v65_v25 = vld [vmem:[#allocation5 + $0x30] sm:$0xff] }
  0x17   :  { %121 = vmatpush.msra.mxu1 %v82_v8  ;;  %v64_v26 = vld [vmem:[#allocation5 + $0x28] sm:$0xff]  ;;  %v63_v27 = vld [vmem:[#allocation5 + $0x20] sm:$0xff]  ;;  %v62_v28 = vld [vmem:[#allocation5 + $0x18] sm:$0xff] }
  0x18   :  { %101 = vmatpush.msra.mxu0 %v81_v9  ;;  %v61_v29 = vld [vmem:[#allocation5 + $0x10] sm:$0xff]  ;;  %v60_v30 = vld [vmem:[#allocation5 + $0x8] sm:$0xff]  ;;  %v59_v31 = vld [vmem:[#allocation5] sm:$0xff] }
  0x19   :  { %122 = vmatpush.msra.mxu1 %v80_v10  ;;  %v58_v32 = vld [vmem:[#allocation2] sm:$0xff]  ;;  %v91_v33 = vld [vmem:[#allocation7] sm:$0x3] }
  0x1a   :  { %102 = vmatpush.msra.mxu0 %v79_v11  ;;  %v94_v34 = vperm.slane %v91_v33, 1  ;;  %v93_v35 = vperm.slane %v91_v33, 0 }
  0x1b   :  { %123 = vmatpush.msra.mxu1 %v78_v12 }
  0x1c   :  { %103 = vmatpush.msra.mxu0 %v77_v13 }
  0x1d   :  { %124 = vmatpush.msra.mxu1 %v76_v14 }
  0x1e   :  { %104 = vmatpush.msra.mxu0 %v75_v15 }
  0x1f   :  { %125 = vmatpush.msra.mxu1 %v74_v16 }
  0x20   :  { %105 = vmatpush.msra.mxu0 %v73_v17 }
  0x21   :  { %126 = vmatpush.msra.mxu1 %v72_v18 }
  0x22   :  { %106 = vmatpush.msra.mxu0 %v71_v19 }
  0x23   :  { %127 = vmatpush.msra.mxu1 %v70_v20 }
  0x24   :  { %107 = vmatpush.msra.mxu0 %v69_v21 }
  0x25   :  { %128 = vmatpush.msra.mxu1 %v68_v22 }
  0x26   :  { %108 = vmatpush.msra.mxu0 %v67_v23 }
  0x27   :  { %129 = vmatpush.msra.mxu1 %v66_v24 }
  0x28   :  { %109 = vmatpush.msra.mxu0 %v65_v25 }
  0x29   :  { %130 = vmatpush.msra.mxu1 %v64_v26 }
  0x2a   :  { %110 = vmatpush.msra.mxu0 %v63_v27 }
  0x2b   :  { %131 = vmatpush.msra.mxu1 %v62_v28 }
  0x2c   :  { %111 = vmatpush.msra.mxu0 %v61_v29 }
  0x2d   :  { %132 = vmatpush.msra.mxu1 %v60_v30 }
  0x2e   :  { %112 = vmatpush.msra.mxu0 %v59_v31  ;;  %133 = vmatmul.f32.vlgmr.msra.gmra.mxu1 %v58_v32 }
  0x2f   :  { %113 = vmatmul.f32.vlgmr.msra.gmra.mxu0 %v58_v32 }
  0xab   :  { %v134_v36 = vpop.f32.mrf.mxu1 }
  0xac   :  { %v114_v37 = vpop.f32.mrf.mxu0  ;;  %v135_v38 = vadd.f32 %v134_v36, %v94_v34 }
  0xad   :  { %v115_v39 = vadd.f32 %v114_v37, %v93_v35 }
  0xae   :  { %v138_v40 = vmul.f32 0.5, %v135_v38 }
  0xaf   :  { %170 = vtanh.f32 %v115_v39 }
  0xb0   :  { %172 = vtanh.f32 %v138_v40 }
  0xb5   :  { %v171_v41 = vpop.eup %170 }
  0xb6   :  { %v173_v42 = vpop.eup %172  ;;  %v142_v44 = vsub.f32 %v171_v41, %v58_v32 }
  0xb7   :  { %v140_v43 = vadd.f32 1.0, %v173_v42 }
  0xb9   :  { %v141_v45 = vmul.f32 0.5, %v140_v43 }
  0xbb   :  { %v143_v46 = vmul.f32 %v142_v44, %v141_v45 }
  0xbd   :  { %v144_v47 = vadd.f32 %v143_v46, %v58_v32 }
  0xbf   :  { %145 = vst [vmem:[#allocation8] sm:$0xff] %v144_v47 }
  0xc0   :  { %156 = dma.vmem_to_hbm [thread:$0]  %s152_s2, 128, %s154_s30, [#allocation4]  }
  0xc1   :  { %274 = dma.done.wait [#allocation4], 128  }
  0xc2   :  { %275 = vsyncadd [#allocation4], 4294967168 }
  0xc3   :  { %161 = vsyncpa [#allocation3], 1 }
  0xc4   :  { %162 = vsyncpa [#allocation6], 1 }
  0xc5   :  { %163 = vsyncpa [#allocation4], 1 }

</bundles_post_ra>
